<compile_context>
chip_gen: v6e
topology: v6e:2x2x1
jax: 0.10.0
libtpu: 0.0.40
codegen_flags: <defaults>
</compile_context>

<pallas_src>
import jax
import jax.numpy as jnp
from jax.experimental import pallas as pl
from jax.experimental.pallas import tpu as pltpu


def _layerscale_kernel(x_ref, w_ref, o_ref):
    # x_ref/o_ref: (TR, TL) tile; w_ref: (TR, 1) per-row scale column.
    # (TR, 1) * (TR, TL) is a lane broadcast handled entirely on the VPU.
    o_ref[...] = x_ref[...] * w_ref[...]


def _round_up(x: int, m: int) -> int:
    return ((x + m - 1) // m) * m


def _tile_targets():
    """Generation-aware (row_tile, lane_tile, vmem_limit) targets."""
    tr, tl, vmem = 512, 2048, 32 * 1024 * 1024          # safe everywhere (v5e default)
    try:
        kind = jax.devices()[0].device_kind.lower()
    except Exception:
        return tr, tl, vmem
    if ("v2" in kind) or ("v3" in kind) or ("v4" in kind) or ("v5" in kind):
        return tr, tl, vmem
    # v6e / v7x: faster HBM makes the ~0.35us/step overhead relatively more
    # expensive -> larger lane tile; 2x(in)+2x(out) 8 MiB f32 tiles ~= 32 MiB,
    # still under v7x's 64 MiB physical VMEM with a 48 MiB scoped limit.
    return tr, 4096, 48 * 1024 * 1024


def _pick_tiles(rows: int, cols: int, tr_target: int, tl_target: int):
    # Block dims must be multiples of (8, 128) or equal the full array dims;
    # targets are already multiples, and "use full dim if smaller" is legal.
    TR = rows if rows <= tr_target else tr_target
    TL = cols if cols <= tl_target else tl_target
    # v7x megacore: if both axes collapse to a single block but the problem is
    # big enough to matter, split rows so >= 2 parallel blocks exist and both
    # TensorCores get work. Harmless (one extra ~0.35us step) on v5e/v6e.
    if rows <= tr_target and cols <= tl_target and rows >= 16 and rows * cols >= (1 << 18):
        TR = _round_up(pl.cdiv(rows, 2), 8)
    return TR, TL


def layer_scale(x: jax.Array, weight: jax.Array) -> jax.Array:
    """x: (B, C, H, W), weight: (C,). Returns x * weight[None, :, None, None]."""
    B, C, H, W = x.shape
    assert weight.shape == (C,)

    rows = B * C
    cols = H * W

    # Lane-dense 2-D view: rows = (b, c) pairs, cols = flattened spatial.
    # TODO(synk): if H*W is small and not a multiple of 128 (e.g. 7x7 maps),
    # every store is lane-masked and the kernel falls off the HBM roofline; a
    # padded / re-folded layout would be needed for that regime.
    x2 = x.reshape(rows, cols)
    # Per-row weight column, cast to x.dtype so the product dtype matches out.
    w_col = jnp.broadcast_to(weight.astype(x.dtype)[None, :], (B, C)).reshape(rows, 1)

    tr_target, tl_target, vmem_limit = _tile_targets()
    TR, TL = _pick_tiles(rows, cols, tr_target, tl_target)

    grid = (pl.cdiv(rows, TR), pl.cdiv(cols, TL))

    itemsize = jnp.dtype(x.dtype).itemsize
    cost = pl.CostEstimate(
        flops=rows * cols,
        transcendentals=0,
        bytes_accessed=(2 * rows * cols + rows) * itemsize,
    )

    out2 = pl.pallas_call(
        _layerscale_kernel,
        out_shape=jax.ShapeDtypeStruct((rows, cols), x.dtype),
        grid_spec=pl.GridSpec(
            grid=grid,
            in_specs=[
                pl.BlockSpec((TR, TL), lambda r, l: (r, l)),   # x tile
                pl.BlockSpec((TR, 1), lambda r, l: (r, 0)),    # weight column
            ],
            out_specs=pl.BlockSpec((TR, TL), lambda r, l: (r, l)),
        ),
        # x2 -> out2 aliasing: write the scaled result over x2's HBM buffer.
        input_output_aliases={0: 0},
        cost_estimate=cost,
        compiler_params=pltpu.CompilerParams(
            dimension_semantics=("parallel", "parallel"),
            vmem_limit_bytes=vmem_limit,
        ),
    )(x2, w_col)

    return out2.reshape(B, C, H, W)


if __name__ == "__main__":
    key = jax.random.PRNGKey(0)

    B, C, H, W = 2, 4, 16, 16
    dim = C
    init_values = 1e-05

    # Deterministic parameter init, exactly as in LayerScale.__init__:
    # weight = ones(dim) * init_values
    weight = jnp.ones((dim,), dtype=jnp.float32) * init_values

    x = jax.random.normal(key, (B, C, H, W), dtype=jnp.float32)

    # Reference computed BEFORE the kernel runs (kernel aliases its input
    # buffer; without donation XLA copies, but keep the test order safe).
    ref = x * weight[None, :, None, None]

    out = jax.jit(layer_scale)(x, weight)
    out = jax.block_until_ready(out)

    assert out.shape == ref.shape and out.dtype == ref.dtype
    assert jnp.allclose(out, ref, atol=1e-7, rtol=1e-6)

    # TODO(synk): PyTorch's `inplace=True` path maps to donating x at the jit
    # boundary: jax.jit(layer_scale, donate_argnums=0); the in-kernel aliasing
    # is already in place via input_output_aliases={0: 0}.
    print("KERNEL_OK")
</pallas_src>

<mosaic_0001>
module attributes {stable_mosaic.version = 11 : i64} {
  func.func @_layerscale_kernel(%arg0: i32, %arg1: i32, %arg2: memref<8x256xf32, #tpu.memory_space<vmem>>, %arg3: memref<8x1xf32, #tpu.memory_space<vmem>>, %arg4: memref<8x256xf32, #tpu.memory_space<vmem>>) attributes {dimension_semantics = [#tpu.dimension_semantics<parallel>, #tpu.dimension_semantics<parallel>], iteration_bounds = array<i64: 1, 1>, scalar_prefetch = 0 : i64, scratch_operands = 0 : i64, tpu.core_type = #tpu.core_type<tc>, window_params = [{transform_indices = @transform_0, window_bounds = array<i64: 8, 256>}, {transform_indices = @transform_1, window_bounds = array<i64: 8, 1>}, {transform_indices = @transform_2, window_bounds = array<i64: 8, 256>}]} {
    %c0 = arith.constant 0 : index
    %c0_0 = arith.constant 0 : index
    %0 = vector.load %arg2[%c0, %c0_0] : memref<8x256xf32, #tpu.memory_space<vmem>>, vector<8x256xf32>
    %c0_1 = arith.constant 0 : index
    %c0_2 = arith.constant 0 : index
    %1 = vector.load %arg3[%c0_1, %c0_2] : memref<8x1xf32, #tpu.memory_space<vmem>>, vector<8x1xf32>
    %2 = vector.broadcast %1 : vector<8x1xf32> to vector<8x256xf32>
    %3 = arith.mulf %0, %2 : vector<8x256xf32>
    %c0_3 = arith.constant 0 : index
    %c0_4 = arith.constant 0 : index
    %4 = vector.load %arg4[%c0_3, %c0_4] : memref<8x256xf32, #tpu.memory_space<vmem>>, vector<8x256xf32>
    tpu.vector_store %arg4[%c0_3, %c0_4], %3 {strides = array<i32>} : memref<8x256xf32, #tpu.memory_space<vmem>>, vector<8x256xf32>,
    return
  }
  func.func @transform_0(%arg0: i32, %arg1: i32) -> (i32, i32) {
    %c0_i32 = arith.constant 0 : i32
    return %arg0, %arg1 : i32, i32
  }
  func.func @transform_1(%arg0: i32, %arg1: i32) -> (i32, i32) {
    %c0_i32 = arith.constant 0 : i32
    %c0_i32_0 = arith.constant 0 : i32
    return %arg0, %c0_i32 : i32, i32
  }
  func.func @transform_2(%arg0: i32, %arg1: i32) -> (i32, i32) {
    %c0_i32 = arith.constant 0 : i32
    return %arg0, %arg1 : i32, i32
  }
}

</mosaic_0001>

<bundles_post_ra>
// kernel: layer_scale.1
= control target key start
LH: loop header
LB: loop body
LE: loop exit
PB: predicated region body
PF: predicated region fallthrough
CT: control target
= control target key end

     0   :  { %v29_v0 = vmov 0   ;;  %s60_s1 = inlined_call_operand.vmem [shape: f32[8,1], index: 1, kind: input, shape index: {}]   ;;  %s61_s0 = inlined_call_operand.vmem [shape: f32[8,256], index: 0, kind: input, shape index: {}, may-alias: {0,2}]   ;;  %s62_s2 = inlined_call_operand.vmem [shape: f32[8,256], index: 2, kind: output, shape index: {}, may-alias: {0,2}]  }
   0x1   :  { %28 = vset.pattern.permute.xlu0 %v29_v0  ;;  %v13_v1 = vld [vmem:[%s60_s1] sm:$0xff]  ;;  %v12_v3 = vld [vmem:[%s61_s0 + $0x8] sm:$0xff] }
   0x2   :  { %16 = vperm.xlu0 %28, %v13_v1   ;;  %v11_v2 = vld [vmem:[%s61_s0] sm:$0xff] }
  0x7d   :  { %v17_v4 = vpop.permute.xlu0 %16 }
  0x7e   :  { %v19_v5 = vmul.f32 %v17_v4, %v11_v2  ;;  %v20_v6 = vmul.f32 %v17_v4, %v12_v3 }
  0x80   :  { %21 = vst [vmem:[%s62_s2] sm:$0xff] %v19_v5  ;;  %22 = vst [vmem:[%s62_s2 + $0x8] sm:$0xff] %v20_v6 }

</bundles_post_ra>
